<compile_context>
chip_gen: v7x
topology: tpu7x:2x2x1
jax: 0.10.0
libtpu: 0.0.40
codegen_flags: <defaults>
</compile_context>

<pallas_src>
import jax
import jax.numpy as jnp
from jax import lax
from jax.experimental import pallas as pl
from jax.experimental.pallas import tpu as pltpu

HIDDEN = 32
INPUT = 1
NUM_LAYERS = 2
OUTPUT = 1
B_PAD = 8  # pad batch to a sublane multiple


def _lstm_kernel(xw_ref, wbig_ref, wfc_ref, bfc_ref, out_ref):
    S, Bp, G = xw_ref.shape        # (T+1, 8, 8H)
    HH = G // 4                    # 2H: joint (layer-0 | layer-1) gate width
    H = HH // 2

    wbig = wbig_ref[...]           # (2H, 8H) fused stationary recurrent weight
    wfc = wfc_ref[...]             # (1, H)
    bfc = bfc_ref[...]             # (1, 1)

    def cells(gates, ccat_prev):
        # gates: (Bp, 8H) pre-activations of BOTH layers, gate-major interleaved
        # [i0 i1 | f0 f1 | g0 g1 | o0 o1].  One full-width sigmoid (g columns
        # pre-scaled x2 in the wrapper, so tanh(x) = 2*sigmoid(2x) - 1), then
        # full-width VPU math on the joint (Bp, 2H) c/h carries — no per-layer
        # lane slicing or concatenation on the serial dependency chain.
        sg = jax.nn.sigmoid(gates)
        i = sg[:, 0 * HH:1 * HH]
        f = sg[:, 1 * HH:2 * HH]
        g = 2.0 * sg[:, 2 * HH:3 * HH] - 1.0
        o = sg[:, 3 * HH:4 * HH]
        ccat = f * ccat_prev + i * g
        hcat = o * jnp.tanh(ccat)
        return hcat, ccat

    zero = jnp.zeros((Bp, HH), jnp.float32)

    # Wavefront step 0: both hidden states are zero, so the recurrent matmul
    # vanishes — gates come straight from the precomputed input slab.  The
    # layer-1 half of the result is bias-only garbage at s=0; mask it so the
    # recurrence starts from h1(-1) = c1(-1) = 0.
    hcat, ccat = cells(xw_ref[0], zero)
    lane = lax.broadcasted_iota(jnp.int32, (Bp, HH), 1)
    mask0 = (lane < H).astype(jnp.float32)
    hcat = hcat * mask0
    ccat = ccat * mask0

    # Wavefront steps 1..T (fully unrolled, static indices — T is tiny): a
    # single (Bp,2H)@(2H,8H) matmul per step produces layer-0's gates at t=s
    # and layer-1's gates at t=s-1 together, halving the serial MXU chain.
    # TODO(synk): for T beyond ~32, stream xw via a grid over T ("arbitrary")
    # with h/c carried in VMEM scratch and partial unroll, and keep wbig
    # MXU-resident via pltpu.matmul_push_rhs instead of re-pushing it in
    # jnp.dot each step.
    for s in range(1, S):
        gates = xw_ref[s] + jnp.dot(hcat, wbig,
                                    preferred_element_type=jnp.float32)
        hcat, ccat = cells(gates, ccat)

    # After step T the upper half of hcat holds layer-1's last hidden state
    # h1(T-1).  Final Linear as broadcast-mul + lane reduction.
    h1 = hcat[:, H:2 * H]
    out_ref[...] = jnp.sum(h1 * wfc, axis=-1, keepdims=True) + bfc


def lstm_forward(x, params):
    """x: (B, T, input_dim) float32, batch_first like the PyTorch module."""
    B, T, _ = x.shape
    wih0, whh0, bih0, bhh0, wih1, whh1, bih1, bhh1, wfc, bfc = params
    H = HIDDEN

    x32 = x.astype(jnp.float32)

    # Hoisted layer-0 input projection + fused layer-0 bias (PyTorch gate order
    # [i, f, g, o] along the 4H axis).
    xg0 = jnp.einsum('bti,gi->btg', x32, wih0) + (bih0 + bhh0)   # (B, T, 4H)
    b1 = bih1 + bhh1                                             # (4H,)

    # Build the fused wavefront weight W_big (2H, 8H) and input slab
    # xw (T+1, B_PAD, 8H) with gate-major interleaved columns
    #   [ i0 | i1 | f0 | f1 | g0 | g1 | o0 | o1 ],  each block H wide.
    # W_big rows 0:H  (from h0):  whh0ᵀ in layer-0 blocks, wih1ᵀ in layer-1.
    # W_big rows H:2H (from h1):  0 in layer-0 blocks,     whh1ᵀ in layer-1.
    # g blocks are pre-scaled by 2 so a single in-kernel sigmoid reproduces
    # tanh via tanh(x) = 2*sigmoid(2x) - 1.
    zeros_hh = jnp.zeros((H, H), jnp.float32)
    wcols, xcols = [], []
    for k, sc in enumerate((1.0, 1.0, 2.0, 1.0)):                # i, f, g, o
        r = slice(k * H, (k + 1) * H)
        top = jnp.concatenate([whh0[r].T, wih1[r].T], axis=1)    # (H, 2H)
        bot = jnp.concatenate([zeros_hh, whh1[r].T], axis=1)     # (H, 2H)
        wcols.append(jnp.concatenate([top, bot], axis=0) * sc)   # (2H, 2H)

        # layer-0 part: input projection at wavefront steps 0..T-1; step T is a
        # discarded half-step (zeros).  layer-1 part: constant bias b1.
        l0 = jnp.pad(xg0[:, :, r] * sc, ((0, 0), (0, 1), (0, 0)))        # (B, T+1, H)
        l1 = jnp.broadcast_to(b1[r] * sc, (B, T + 1, H))                  # (B, T+1, H)
        xcols += [l0, l1]

    wbig = jnp.concatenate(wcols, axis=1)                        # (2H, 8H)
    xw = jnp.concatenate(xcols, axis=-1)                         # (B, T+1, 8H)
    xw = jnp.transpose(xw, (1, 0, 2))                            # (T+1, B, 8H)
    xw = jnp.pad(xw, ((0, 0), (0, B_PAD - B), (0, 0)))           # (T+1, B_PAD, 8H)

    args = (xw, wbig, wfc, bfc[None, :])

    out = pl.pallas_call(
        _lstm_kernel,
        out_shape=jax.ShapeDtypeStruct((B_PAD, OUTPUT), jnp.float32),
        in_specs=[pl.BlockSpec(memory_space=pltpu.MemorySpace.VMEM)] * len(args),
        out_specs=pl.BlockSpec(memory_space=pltpu.MemorySpace.VMEM),
    )(*args)
    return out[:B]


def lstm_ref(x, params):
    """Pure-JAX reference matching nn.LSTM(batch_first=True) + nn.Linear."""
    wih0, whh0, bih0, bhh0, wih1, whh1, bih1, bhh1, wfc, bfc = params
    B, T, _ = x.shape
    H = HIDDEN
    h = [jnp.zeros((B, H), jnp.float32), jnp.zeros((B, H), jnp.float32)]
    c = [jnp.zeros((B, H), jnp.float32), jnp.zeros((B, H), jnp.float32)]

    def cell(xt, hp, cp, wih, whh, bih, bhh):
        g = xt @ wih.T + hp @ whh.T + bih + bhh
        i = jax.nn.sigmoid(g[:, :H])
        f = jax.nn.sigmoid(g[:, H:2 * H])
        gg = jnp.tanh(g[:, 2 * H:3 * H])
        o = jax.nn.sigmoid(g[:, 3 * H:])
        cn = f * cp + i * gg
        hn = o * jnp.tanh(cn)
        return hn, cn

    for t in range(T):
        xt = x[:, t, :]
        h[0], c[0] = cell(xt, h[0], c[0], wih0, whh0, bih0, bhh0)
        h[1], c[1] = cell(h[0], h[1], c[1], wih1, whh1, bih1, bhh1)
    return h[1] @ wfc.T + bfc


if __name__ == "__main__":
    key = jax.random.PRNGKey(0)
    ks = jax.random.split(key, 11)
    H = HIDDEN
    bound = 1.0 / float(jnp.sqrt(H))

    def u(k_, shape):
        return jax.random.uniform(k_, shape, jnp.float32, -bound, bound)

    # PyTorch nn.LSTM / nn.Linear parameter shapes, deterministically initialized
    params = (
        u(ks[0], (4 * H, INPUT)),   # weight_ih_l0
        u(ks[1], (4 * H, H)),       # weight_hh_l0
        u(ks[2], (4 * H,)),         # bias_ih_l0
        u(ks[3], (4 * H,)),         # bias_hh_l0
        u(ks[4], (4 * H, H)),       # weight_ih_l1
        u(ks[5], (4 * H, H)),       # weight_hh_l1
        u(ks[6], (4 * H,)),         # bias_ih_l1
        u(ks[7], (4 * H,)),         # bias_hh_l1
        u(ks[8], (OUTPUT, H)),      # fc.weight
        u(ks[9], (OUTPUT,)),        # fc.bias
    )

    x = jax.random.normal(ks[10], (2, 8, INPUT), jnp.float32)  # (batch=2, seq=8, input_dim=1)

    out = lstm_forward(x, params)
    jax.block_until_ready(out)

    ref = lstm_ref(x, params)
    assert out.shape == (2, OUTPUT), out.shape
    assert jnp.allclose(out, ref, atol=1e-4, rtol=1e-4), (out, ref)
    print("KERNEL_OK")
</pallas_src>

<mosaic_0001>
module attributes {stable_mosaic.version = 11 : i64} {
  func.func @_lstm_kernel(%arg0: memref<9x8x256xf32, #tpu.memory_space<vmem>>, %arg1: memref<64x256xf32, #tpu.memory_space<vmem>>, %arg2: memref<1x32xf32, #tpu.memory_space<vmem>>, %arg3: memref<1x1xf32, #tpu.memory_space<vmem>>, %arg4: memref<8x1xf32, #tpu.memory_space<vmem>>) attributes {dimension_semantics = [], scalar_prefetch = 0 : i64, scratch_operands = 0 : i64, tpu.core_type = #tpu.core_type<tc>} {
    %c0 = arith.constant 0 : index
    %c0_0 = arith.constant 0 : index
    %0 = vector.load %arg1[%c0, %c0_0] : memref<64x256xf32, #tpu.memory_space<vmem>>, vector<64x256xf32>
    %c0_1 = arith.constant 0 : index
    %c0_2 = arith.constant 0 : index
    %1 = vector.load %arg2[%c0_1, %c0_2] : memref<1x32xf32, #tpu.memory_space<vmem>>, vector<1x32xf32>
    %c0_3 = arith.constant 0 : index
    %c0_4 = arith.constant 0 : index
    %2 = vector.load %arg3[%c0_3, %c0_4] : memref<1x1xf32, #tpu.memory_space<vmem>>, vector<1x1xf32>
    %cst = arith.constant 0.000000e+00 : f32
    %3 = vector.broadcast %cst : f32 to vector<8x64xf32>
    %c0_5 = arith.constant 0 : index
    %c0_6 = arith.constant 0 : index
    %c0_7 = arith.constant 0 : index
    %4 = vector.load %arg0[%c0_5, %c0_6, %c0_7] : memref<9x8x256xf32, #tpu.memory_space<vmem>>, vector<1x8x256xf32>
    %5 = vector.shape_cast %4 : vector<1x8x256xf32> to vector<8x256xf32>
    %6 = arith.negf %5 : vector<8x256xf32>
    %7 = math.exp %6 : vector<8x256xf32>
    %cst_8 = arith.constant 1.000000e+00 : f32
    %8 = vector.broadcast %cst_8 : f32 to vector<8x256xf32>
    %9 = arith.addf %8, %7 : vector<8x256xf32>
    %10 = arith.divf %8, %9 : vector<8x256xf32>
    %11 = vector.extract_strided_slice %10 {offsets = [0, 0], sizes = [8, 64], strides = [1, 1]} : vector<8x256xf32> to vector<8x64xf32>
    %12 = vector.extract_strided_slice %10 {offsets = [0, 64], sizes = [8, 64], strides = [1, 1]} : vector<8x256xf32> to vector<8x64xf32>
    %13 = vector.extract_strided_slice %10 {offsets = [0, 128], sizes = [8, 64], strides = [1, 1]} : vector<8x256xf32> to vector<8x64xf32>
    %cst_9 = arith.constant 2.000000e+00 : f32
    %14 = vector.broadcast %cst_9 : f32 to vector<8x64xf32>
    %15 = arith.mulf %14, %13 : vector<8x64xf32>
    %cst_10 = arith.constant 1.000000e+00 : f32
    %16 = vector.broadcast %cst_10 : f32 to vector<8x64xf32>
    %17 = arith.subf %15, %16 : vector<8x64xf32>
    %18 = vector.extract_strided_slice %10 {offsets = [0, 192], sizes = [8, 64], strides = [1, 1]} : vector<8x256xf32> to vector<8x64xf32>
    %19 = arith.mulf %12, %3 : vector<8x64xf32>
    %20 = arith.mulf %11, %17 : vector<8x64xf32>
    %21 = arith.addf %19, %20 : vector<8x64xf32>
    %22 = math.tanh %21 : vector<8x64xf32>
    %23 = arith.mulf %18, %22 : vector<8x64xf32>
    %24 = tpu.iota {dimensions = array<i32: 1>} : vector<8x64xi32>
    %c32_i32 = arith.constant 32 : i32
    %25 = vector.broadcast %c32_i32 : i32 to vector<8x64xi32>
    %26 = arith.cmpi slt, %24, %25 : vector<8x64xi32>
    %27 = arith.extui %26 : vector<8x64xi1> to vector<8x64xi32>
    %28 = arith.sitofp %27 : vector<8x64xi32> to vector<8x64xf32>
    %29 = arith.mulf %23, %28 : vector<8x64xf32>
    %30 = arith.mulf %21, %28 : vector<8x64xf32>
    %c1 = arith.constant 1 : index
    %c0_11 = arith.constant 0 : index
    %c0_12 = arith.constant 0 : index
    %31 = vector.load %arg0[%c1, %c0_11, %c0_12] : memref<9x8x256xf32, #tpu.memory_space<vmem>>, vector<1x8x256xf32>
    %32 = vector.shape_cast %31 : vector<1x8x256xf32> to vector<8x256xf32>
    %cst_13 = arith.constant dense<0.000000e+00> : vector<8x256xf32>
    %33 = tpu.matmul %29, %0, %cst_13 {dimension_numbers = #tpu.dot_dimension_numbers<[1], [0], [0], [1], [0, 0, 1, 1], [], []>} : vector<8x64xf32>, vector<64x256xf32>, vector<8x256xf32> -> vector<8x256xf32>
    %34 = arith.addf %32, %33 : vector<8x256xf32>
    %35 = arith.negf %34 : vector<8x256xf32>
    %36 = math.exp %35 : vector<8x256xf32>
    %cst_14 = arith.constant 1.000000e+00 : f32
    %37 = vector.broadcast %cst_14 : f32 to vector<8x256xf32>
    %38 = arith.addf %37, %36 : vector<8x256xf32>
    %39 = arith.divf %37, %38 : vector<8x256xf32>
    %40 = vector.extract_strided_slice %39 {offsets = [0, 0], sizes = [8, 64], strides = [1, 1]} : vector<8x256xf32> to vector<8x64xf32>
    %41 = vector.extract_strided_slice %39 {offsets = [0, 64], sizes = [8, 64], strides = [1, 1]} : vector<8x256xf32> to vector<8x64xf32>
    %42 = vector.extract_strided_slice %39 {offsets = [0, 128], sizes = [8, 64], strides = [1, 1]} : vector<8x256xf32> to vector<8x64xf32>
    %cst_15 = arith.constant 2.000000e+00 : f32
    %43 = vector.broadcast %cst_15 : f32 to vector<8x64xf32>
    %44 = arith.mulf %43, %42 : vector<8x64xf32>
    %cst_16 = arith.constant 1.000000e+00 : f32
    %45 = vector.broadcast %cst_16 : f32 to vector<8x64xf32>
    %46 = arith.subf %44, %45 : vector<8x64xf32>
    %47 = vector.extract_strided_slice %39 {offsets = [0, 192], sizes = [8, 64], strides = [1, 1]} : vector<8x256xf32> to vector<8x64xf32>
    %48 = arith.mulf %41, %30 : vector<8x64xf32>
    %49 = arith.mulf %40, %46 : vector<8x64xf32>
    %50 = arith.addf %48, %49 : vector<8x64xf32>
    %51 = math.tanh %50 : vector<8x64xf32>
    %52 = arith.mulf %47, %51 : vector<8x64xf32>
    %c2 = arith.constant 2 : index
    %c0_17 = arith.constant 0 : index
    %c0_18 = arith.constant 0 : index
    %53 = vector.load %arg0[%c2, %c0_17, %c0_18] : memref<9x8x256xf32, #tpu.memory_space<vmem>>, vector<1x8x256xf32>
    %54 = vector.shape_cast %53 : vector<1x8x256xf32> to vector<8x256xf32>
    %cst_19 = arith.constant dense<0.000000e+00> : vector<8x256xf32>
    %55 = tpu.matmul %52, %0, %cst_19 {dimension_numbers = #tpu.dot_dimension_numbers<[1], [0], [0], [1], [0, 0, 1, 1], [], []>} : vector<8x64xf32>, vector<64x256xf32>, vector<8x256xf32> -> vector<8x256xf32>
    %56 = arith.addf %54, %55 : vector<8x256xf32>
    %57 = arith.negf %56 : vector<8x256xf32>
    %58 = math.exp %57 : vector<8x256xf32>
    %cst_20 = arith.constant 1.000000e+00 : f32
    %59 = vector.broadcast %cst_20 : f32 to vector<8x256xf32>
    %60 = arith.addf %59, %58 : vector<8x256xf32>
    %61 = arith.divf %59, %60 : vector<8x256xf32>
    %62 = vector.extract_strided_slice %61 {offsets = [0, 0], sizes = [8, 64], strides = [1, 1]} : vector<8x256xf32> to vector<8x64xf32>
    %63 = vector.extract_strided_slice %61 {offsets = [0, 64], sizes = [8, 64], strides = [1, 1]} : vector<8x256xf32> to vector<8x64xf32>
    %64 = vector.extract_strided_slice %61 {offsets = [0, 128], sizes = [8, 64], strides = [1, 1]} : vector<8x256xf32> to vector<8x64xf32>
    %cst_21 = arith.constant 2.000000e+00 : f32
    %65 = vector.broadcast %cst_21 : f32 to vector<8x64xf32>
    %66 = arith.mulf %65, %64 : vector<8x64xf32>
    %cst_22 = arith.constant 1.000000e+00 : f32
    %67 = vector.broadcast %cst_22 : f32 to vector<8x64xf32>
    %68 = arith.subf %66, %67 : vector<8x64xf32>
    %69 = vector.extract_strided_slice %61 {offsets = [0, 192], sizes = [8, 64], strides = [1, 1]} : vector<8x256xf32> to vector<8x64xf32>
    %70 = arith.mulf %63, %50 : vector<8x64xf32>
    %71 = arith.mulf %62, %68 : vector<8x64xf32>
    %72 = arith.addf %70, %71 : vector<8x64xf32>
    %73 = math.tanh %72 : vector<8x64xf32>
    %74 = arith.mulf %69, %73 : vector<8x64xf32>
    %c3 = arith.constant 3 : index
    %c0_23 = arith.constant 0 : index
    %c0_24 = arith.constant 0 : index
    %75 = vector.load %arg0[%c3, %c0_23, %c0_24] : memref<9x8x256xf32, #tpu.memory_space<vmem>>, vector<1x8x256xf32>
    %76 = vector.shape_cast %75 : vector<1x8x256xf32> to vector<8x256xf32>
    %cst_25 = arith.constant dense<0.000000e+00> : vector<8x256xf32>
    %77 = tpu.matmul %74, %0, %cst_25 {dimension_numbers = #tpu.dot_dimension_numbers<[1], [0], [0], [1], [0, 0, 1, 1], [], []>} : vector<8x64xf32>, vector<64x256xf32>, vector<8x256xf32> -> vector<8x256xf32>
    %78 = arith.addf %76, %77 : vector<8x256xf32>
    %79 = arith.negf %78 : vector<8x256xf32>
    %80 = math.exp %79 : vector<8x256xf32>
    %cst_26 = arith.constant 1.000000e+00 : f32
    %81 = vector.broadcast %cst_26 : f32 to vector<8x256xf32>
    %82 = arith.addf %81, %80 : vector<8x256xf32>
    %83 = arith.divf %81, %82 : vector<8x256xf32>
    %84 = vector.extract_strided_slice %83 {offsets = [0, 0], sizes = [8, 64], strides = [1, 1]} : vector<8x256xf32> to vector<8x64xf32>
    %85 = vector.extract_strided_slice %83 {offsets = [0, 64], sizes = [8, 64], strides = [1, 1]} : vector<8x256xf32> to vector<8x64xf32>
    %86 = vector.extract_strided_slice %83 {offsets = [0, 128], sizes = [8, 64], strides = [1, 1]} : vector<8x256xf32> to vector<8x64xf32>
    %cst_27 = arith.constant 2.000000e+00 : f32
    %87 = vector.broadcast %cst_27 : f32 to vector<8x64xf32>
    %88 = arith.mulf %87, %86 : vector<8x64xf32>
    %cst_28 = arith.constant 1.000000e+00 : f32
    %89 = vector.broadcast %cst_28 : f32 to vector<8x64xf32>
    %90 = arith.subf %88, %89 : vector<8x64xf32>
    %91 = vector.extract_strided_slice %83 {offsets = [0, 192], sizes = [8, 64], strides = [1, 1]} : vector<8x256xf32> to vector<8x64xf32>
    %92 = arith.mulf %85, %72 : vector<8x64xf32>
    %93 = arith.mulf %84, %90 : vector<8x64xf32>
    %94 = arith.addf %92, %93 : vector<8x64xf32>
    %95 = math.tanh %94 : vector<8x64xf32>
    %96 = arith.mulf %91, %95 : vector<8x64xf32>
    %c4 = arith.constant 4 : index
    %c0_29 = arith.constant 0 : index
    %c0_30 = arith.constant 0 : index
    %97 = vector.load %arg0[%c4, %c0_29, %c0_30] : memref<9x8x256xf32, #tpu.memory_space<vmem>>, vector<1x8x256xf32>
    %98 = vector.shape_cast %97 : vector<1x8x256xf32> to vector<8x256xf32>
    %cst_31 = arith.constant dense<0.000000e+00> : vector<8x256xf32>
    %99 = tpu.matmul %96, %0, %cst_31 {dimension_numbers = #tpu.dot_dimension_numbers<[1], [0], [0], [1], [0, 0, 1, 1], [], []>} : vector<8x64xf32>, vector<64x256xf32>, vector<8x256xf32> -> vector<8x256xf32>
    %100 = arith.addf %98, %99 : vector<8x256xf32>
    %101 = arith.negf %100 : vector<8x256xf32>
    %102 = math.exp %101 : vector<8x256xf32>
    %cst_32 = arith.constant 1.000000e+00 : f32
    %103 = vector.broadcast %cst_32 : f32 to vector<8x256xf32>
    %104 = arith.addf %103, %102 : vector<8x256xf32>
    %105 = arith.divf %103, %104 : vector<8x256xf32>
    %106 = vector.extract_strided_slice %105 {offsets = [0, 0], sizes = [8, 64], strides = [1, 1]} : vector<8x256xf32> to vector<8x64xf32>
    %107 = vector.extract_strided_slice %105 {offsets = [0, 64], sizes = [8, 64], strides = [1, 1]} : vector<8x256xf32> to vector<8x64xf32>
    %108 = vector.extract_strided_slice %105 {offsets = [0, 128], sizes = [8, 64], strides = [1, 1]} : vector<8x256xf32> to vector<8x64xf32>
    %cst_33 = arith.constant 2.000000e+00 : f32
    %109 = vector.broadcast %cst_33 : f32 to vector<8x64xf32>
    %110 = arith.mulf %109, %108 : vector<8x64xf32>
    %cst_34 = arith.constant 1.000000e+00 : f32
    %111 = vector.broadcast %cst_34 : f32 to vector<8x64xf32>
    %112 = arith.subf %110, %111 : vector<8x64xf32>
    %113 = vector.extract_strided_slice %105 {offsets = [0, 192], sizes = [8, 64], strides = [1, 1]} : vector<8x256xf32> to vector<8x64xf32>
    %114 = arith.mulf %107, %94 : vector<8x64xf32>
    %115 = arith.mulf %106, %112 : vector<8x64xf32>
    %116 = arith.addf %114, %115 : vector<8x64xf32>
    %117 = math.tanh %116 : vector<8x64xf32>
    %118 = arith.mulf %113, %117 : vector<8x64xf32>
    %c5 = arith.constant 5 : index
    %c0_35 = arith.constant 0 : index
    %c0_36 = arith.constant 0 : index
    %119 = vector.load %arg0[%c5, %c0_35, %c0_36] : memref<9x8x256xf32, #tpu.memory_space<vmem>>, vector<1x8x256xf32>
    %120 = vector.shape_cast %119 : vector<1x8x256xf32> to vector<8x256xf32>
    %cst_37 = arith.constant dense<0.000000e+00> : vector<8x256xf32>
    %121 = tpu.matmul %118, %0, %cst_37 {dimension_numbers = #tpu.dot_dimension_numbers<[1], [0], [0], [1], [0, 0, 1, 1], [], []>} : vector<8x64xf32>, vector<64x256xf32>, vector<8x256xf32> -> vector<8x256xf32>
    %122 = arith.addf %120, %121 : vector<8x256xf32>
    %123 = arith.negf %122 : vector<8x256xf32>
    %124 = math.exp %123 : vector<8x256xf32>
    %cst_38 = arith.constant 1.000000e+00 : f32
    %125 = vector.broadcast %cst_38 : f32 to vector<8x256xf32>
    %126 = arith.addf %125, %124 : vector<8x256xf32>
    %127 = arith.divf %125, %126 : vector<8x256xf32>
    %128 = vector.extract_strided_slice %127 {offsets = [0, 0], sizes = [8, 64], strides = [1, 1]} : vector<8x256xf32> to vector<8x64xf32>
    %129 = vector.extract_strided_slice %127 {offsets = [0, 64], sizes = [8, 64], strides = [1, 1]} : vector<8x256xf32> to vector<8x64xf32>
    %130 = vector.extract_strided_slice %127 {offsets = [0, 128], sizes = [8, 64], strides = [1, 1]} : vector<8x256xf32> to vector<8x64xf32>
    %cst_39 = arith.constant 2.000000e+00 : f32
    %131 = vector.broadcast %cst_39 : f32 to vector<8x64xf32>
    %132 = arith.mulf %131, %130 : vector<8x64xf32>
    %cst_40 = arith.constant 1.000000e+00 : f32
    %133 = vector.broadcast %cst_40 : f32 to vector<8x64xf32>
    %134 = arith.subf %132, %133 : vector<8x64xf32>
    %135 = vector.extract_strided_slice %127 {offsets = [0, 192], sizes = [8, 64], strides = [1, 1]} : vector<8x256xf32> to vector<8x64xf32>
    %136 = arith.mulf %129, %116 : vector<8x64xf32>
    %137 = arith.mulf %128, %134 : vector<8x64xf32>
    %138 = arith.addf %136, %137 : vector<8x64xf32>
    %139 = math.tanh %138 : vector<8x64xf32>
    %140 = arith.mulf %135, %139 : vector<8x64xf32>
    %c6 = arith.constant 6 : index
    %c0_41 = arith.constant 0 : index
    %c0_42 = arith.constant 0 : index
    %141 = vector.load %arg0[%c6, %c0_41, %c0_42] : memref<9x8x256xf32, #tpu.memory_space<vmem>>, vector<1x8x256xf32>
    %142 = vector.shape_cast %141 : vector<1x8x256xf32> to vector<8x256xf32>
    %cst_43 = arith.constant dense<0.000000e+00> : vector<8x256xf32>
    %143 = tpu.matmul %140, %0, %cst_43 {dimension_numbers = #tpu.dot_dimension_numbers<[1], [0], [0], [1], [0, 0, 1, 1], [], []>} : vector<8x64xf32>, vector<64x256xf32>, vector<8x256xf32> -> vector<8x256xf32>
    %144 = arith.addf %142, %143 : vector<8x256xf32>
    %145 = arith.negf %144 : vector<8x256xf32>
    %146 = math.exp %145 : vector<8x256xf32>
    %cst_44 = arith.constant 1.000000e+00 : f32
    %147 = vector.broadcast %cst_44 : f32 to vector<8x256xf32>
    %148 = arith.addf %147, %146 : vector<8x256xf32>
    %149 = arith.divf %147, %148 : vector<8x256xf32>
    %150 = vector.extract_strided_slice %149 {offsets = [0, 0], sizes = [8, 64], strides = [1, 1]} : vector<8x256xf32> to vector<8x64xf32>
    %151 = vector.extract_strided_slice %149 {offsets = [0, 64], sizes = [8, 64], strides = [1, 1]} : vector<8x256xf32> to vector<8x64xf32>
    %152 = vector.extract_strided_slice %149 {offsets = [0, 128], sizes = [8, 64], strides = [1, 1]} : vector<8x256xf32> to vector<8x64xf32>
    %cst_45 = arith.constant 2.000000e+00 : f32
    %153 = vector.broadcast %cst_45 : f32 to vector<8x64xf32>
    %154 = arith.mulf %153, %152 : vector<8x64xf32>
    %cst_46 = arith.constant 1.000000e+00 : f32
    %155 = vector.broadcast %cst_46 : f32 to vector<8x64xf32>
    %156 = arith.subf %154, %155 : vector<8x64xf32>
    %157 = vector.extract_strided_slice %149 {offsets = [0, 192], sizes = [8, 64], strides = [1, 1]} : vector<8x256xf32> to vector<8x64xf32>
    %158 = arith.mulf %151, %138 : vector<8x64xf32>
    %159 = arith.mulf %150, %156 : vector<8x64xf32>
    %160 = arith.addf %158, %159 : vector<8x64xf32>
    %161 = math.tanh %160 : vector<8x64xf32>
    %162 = arith.mulf %157, %161 : vector<8x64xf32>
    %c7 = arith.constant 7 : index
    %c0_47 = arith.constant 0 : index
    %c0_48 = arith.constant 0 : index
    %163 = vector.load %arg0[%c7, %c0_47, %c0_48] : memref<9x8x256xf32, #tpu.memory_space<vmem>>, vector<1x8x256xf32>
    %164 = vector.shape_cast %163 : vector<1x8x256xf32> to vector<8x256xf32>
    %cst_49 = arith.constant dense<0.000000e+00> : vector<8x256xf32>
    %165 = tpu.matmul %162, %0, %cst_49 {dimension_numbers = #tpu.dot_dimension_numbers<[1], [0], [0], [1], [0, 0, 1, 1], [], []>} : vector<8x64xf32>, vector<64x256xf32>, vector<8x256xf32> -> vector<8x256xf32>
    %166 = arith.addf %164, %165 : vector<8x256xf32>
    %167 = arith.negf %166 : vector<8x256xf32>
    %168 = math.exp %167 : vector<8x256xf32>
    %cst_50 = arith.constant 1.000000e+00 : f32
    %169 = vector.broadcast %cst_50 : f32 to vector<8x256xf32>
    %170 = arith.addf %169, %168 : vector<8x256xf32>
    %171 = arith.divf %169, %170 : vector<8x256xf32>
    %172 = vector.extract_strided_slice %171 {offsets = [0, 0], sizes = [8, 64], strides = [1, 1]} : vector<8x256xf32> to vector<8x64xf32>
    %173 = vector.extract_strided_slice %171 {offsets = [0, 64], sizes = [8, 64], strides = [1, 1]} : vector<8x256xf32> to vector<8x64xf32>
    %174 = vector.extract_strided_slice %171 {offsets = [0, 128], sizes = [8, 64], strides = [1, 1]} : vector<8x256xf32> to vector<8x64xf32>
    %cst_51 = arith.constant 2.000000e+00 : f32
    %175 = vector.broadcast %cst_51 : f32 to vector<8x64xf32>
    %176 = arith.mulf %175, %174 : vector<8x64xf32>
    %cst_52 = arith.constant 1.000000e+00 : f32
    %177 = vector.broadcast %cst_52 : f32 to vector<8x64xf32>
    %178 = arith.subf %176, %177 : vector<8x64xf32>
    %179 = vector.extract_strided_slice %171 {offsets = [0, 192], sizes = [8, 64], strides = [1, 1]} : vector<8x256xf32> to vector<8x64xf32>
    %180 = arith.mulf %173, %160 : vector<8x64xf32>
    %181 = arith.mulf %172, %178 : vector<8x64xf32>
    %182 = arith.addf %180, %181 : vector<8x64xf32>
    %183 = math.tanh %182 : vector<8x64xf32>
    %184 = arith.mulf %179, %183 : vector<8x64xf32>
    %c8 = arith.constant 8 : index
    %c0_53 = arith.constant 0 : index
    %c0_54 = arith.constant 0 : index
    %185 = vector.load %arg0[%c8, %c0_53, %c0_54] : memref<9x8x256xf32, #tpu.memory_space<vmem>>, vector<1x8x256xf32>
    %186 = vector.shape_cast %185 : vector<1x8x256xf32> to vector<8x256xf32>
    %cst_55 = arith.constant dense<0.000000e+00> : vector<8x256xf32>
    %187 = tpu.matmul %184, %0, %cst_55 {dimension_numbers = #tpu.dot_dimension_numbers<[1], [0], [0], [1], [0, 0, 1, 1], [], []>} : vector<8x64xf32>, vector<64x256xf32>, vector<8x256xf32> -> vector<8x256xf32>
    %188 = arith.addf %186, %187 : vector<8x256xf32>
    %189 = arith.negf %188 : vector<8x256xf32>
    %190 = math.exp %189 : vector<8x256xf32>
    %cst_56 = arith.constant 1.000000e+00 : f32
    %191 = vector.broadcast %cst_56 : f32 to vector<8x256xf32>
    %192 = arith.addf %191, %190 : vector<8x256xf32>
    %193 = arith.divf %191, %192 : vector<8x256xf32>
    %194 = vector.extract_strided_slice %193 {offsets = [0, 0], sizes = [8, 64], strides = [1, 1]} : vector<8x256xf32> to vector<8x64xf32>
    %195 = vector.extract_strided_slice %193 {offsets = [0, 64], sizes = [8, 64], strides = [1, 1]} : vector<8x256xf32> to vector<8x64xf32>
    %196 = vector.extract_strided_slice %193 {offsets = [0, 128], sizes = [8, 64], strides = [1, 1]} : vector<8x256xf32> to vector<8x64xf32>
    %cst_57 = arith.constant 2.000000e+00 : f32
    %197 = vector.broadcast %cst_57 : f32 to vector<8x64xf32>
    %198 = arith.mulf %197, %196 : vector<8x64xf32>
    %cst_58 = arith.constant 1.000000e+00 : f32
    %199 = vector.broadcast %cst_58 : f32 to vector<8x64xf32>
    %200 = arith.subf %198, %199 : vector<8x64xf32>
    %201 = vector.extract_strided_slice %193 {offsets = [0, 192], sizes = [8, 64], strides = [1, 1]} : vector<8x256xf32> to vector<8x64xf32>
    %202 = arith.mulf %195, %182 : vector<8x64xf32>
    %203 = arith.mulf %194, %200 : vector<8x64xf32>
    %204 = arith.addf %202, %203 : vector<8x64xf32>
    %205 = math.tanh %204 : vector<8x64xf32>
    %206 = arith.mulf %201, %205 : vector<8x64xf32>
    %207 = vector.extract_strided_slice %206 {offsets = [0, 32], sizes = [8, 32], strides = [1, 1]} : vector<8x64xf32> to vector<8x32xf32>
    %208 = vector.broadcast %1 : vector<1x32xf32> to vector<8x32xf32>
    %209 = arith.mulf %207, %208 : vector<8x32xf32>
    %cst_59 = arith.constant dense<0.000000e+00> : vector<8xf32>
    %210 = vector.multi_reduction <add>, %209, %cst_59 [1] : vector<8x32xf32> to vector<8xf32>
    %211 = vector.shape_cast %210 : vector<8xf32> to vector<8x1xf32>
    %212 = vector.broadcast %2 : vector<1x1xf32> to vector<8x1xf32>
    %213 = arith.addf %211, %212 : vector<8x1xf32>
    %c0_60 = arith.constant 0 : index
    %c0_61 = arith.constant 0 : index
    %214 = vector.load %arg4[%c0_60, %c0_61] : memref<8x1xf32, #tpu.memory_space<vmem>>, vector<8x1xf32>
    tpu.vector_store %arg4[%c0_60, %c0_61], %213 {strides = array<i32>} : memref<8x1xf32, #tpu.memory_space<vmem>>, vector<8x1xf32>,
    return
  }
}

</mosaic_0001>

<bundles_post_ra>
// kernel: tpu_custom_call.1
= control target key start
LH: loop header
LB: loop body
LE: loop exit
PB: predicated region body
PF: predicated region fallthrough
CT: control target
= control target key end

     0   :  { %s1459_s0 = inlined_call_operand.hbm [shape: f32[9,8,256], index: 0, kind: input, shape index: {}]   ;;  %s1460_s1 = inlined_call_operand.hbm [shape: f32[64,256], index: 1, kind: input, shape index: {}]   ;;  %s1461_s2 = inlined_call_operand.vmem [shape: f32[1,32], index: 2, kind: input, shape index: {}]   ;;  %s1462_s3 = inlined_call_operand.<no memory space> [shape: f32[1,1], index: 3, kind: input, shape index: {}]   ;;  %s1463_s4 = inlined_call_operand.vmem [shape: f32[8,1], index: 4, kind: output, shape index: {}]  }
   0x1   :  { %v9_v0 = vstv %s1462_s3 }
   0x2   :  { %10 = vst [vmem:[#allocation2] sm:$0x1] %v9_v0 }
   0x3   :  { %11 = vsyncpa [#allocation4], 0 }
   0x4   :  { %12 = vsyncpa [#allocation6], 0  ;;  %s1278_s17 = smov [#allocation3]   ;;  %s1230_s21 = scalar_lea.hbm %s1459_s0, 2304 }
   0x5   :  { %s18_s18 = sshll.u32 %s1278_s17, 4  ;;  %p1231_p0 = scmp.ne.s32.totalorder %s1459_s0, %s1230_s21  ;;  %s19_s18 = int_to_ptr.vmem [resolvable:$true] %s18_s18 }
   0x6   :  { %p1234_p1 = scmp.lt.u32.totalorder %s1230_s21, %s1459_s0 }
   0x8   :  { %p1236_p2 = pnand %p1234_p1, %p1231_p0 }
   0xa   :  { %1239 = shalt.err (!%p1236_p2)
}
   0xb   :  { %s1240_s3 = scalar_lea.vmem %s19_s18, 2304  ;;  %p1245_p4 = scmp.lt.s32.totalorder %s19_s18, %s19_s18 }
   0xc   :  { %p1241_p3 = scmp.ne.s32.totalorder %s19_s18, %s1240_s3  ;;  %p1246_p5 = scmp.lt.s32.totalorder %s1240_s3, %s1240_s3 }
   0xe   :  { %p1247_p6 = por %p1246_p5, %p1245_p4 }
  0x10   :  { %p1248_p7 = pnand %p1247_p6, %p1241_p3 }
  0x12   :  { %1251 = shalt.err (!%p1248_p7)
}
  0x13   :  { %s1279_s26 = smov 256   ;;  %s1280_s27 = smov 16  }
  0x14   :  { %24 = dma.hbm_to_vmem [thread:$0]  %s1459_s0, 2304, %s19_s18, [#allocation4], %s1279_s26, %s1279_s26, %s1280_s27  }
  0x15   :  { %s1281_s30 = smov [#allocation5]   ;;  %s1252_s8 = scalar_lea.hbm %s1460_s1, 2048 }
  0x16   :  { %s30_s5 = sshll.u32 %s1281_s30, 4  ;;  %p1253_p8 = scmp.ne.s32.totalorder %s1460_s1, %s1252_s8  ;;  %s31_s5 = int_to_ptr.vmem [resolvable:$true] %s30_s5 }
  0x17   :  { %p1256_p9 = scmp.lt.u32.totalorder %s1252_s8, %s1460_s1 }
  0x19   :  { %p1258_p10 = pnand %p1256_p9, %p1253_p8 }
  0x1b   :  { %1261 = shalt.err (!%p1258_p10)
}
  0x1c   :  { %s1262_s13 = scalar_lea.vmem %s31_s5, 2048  ;;  %p1267_p12 = scmp.lt.s32.totalorder %s31_s5, %s31_s5 }
  0x1d   :  { %p1263_p11 = scmp.ne.s32.totalorder %s31_s5, %s1262_s13  ;;  %p1268_p13 = scmp.lt.s32.totalorder %s1262_s13, %s1262_s13 }
  0x1f   :  { %p1269_p0 = por %p1268_p13, %p1267_p12 }
  0x21   :  { %p1270_p1 = pnand %p1269_p0, %p1263_p11 }
  0x23   :  { %1273 = shalt.err (!%p1270_p1)
}
  0x24   :  { %36 = dma.hbm_to_vmem [thread:$0]  %s1460_s1, 2048, %s31_s5, [#allocation6], %s1279_s26, %s1279_s26, %s1280_s27  }
  0x25   :  { %1274 = dma.done.wait [#allocation4], 2304  }
  0x26   :  { %1275 = vsyncadd [#allocation4], 4294964992 }
  0x27   :  { %1276 = dma.done.wait [#allocation6], 2048  }
  0x28   :  { %1277 = vsyncadd [#allocation6], 4294965248  ;;  %v1282_v1 = vmov 0.0   ;;  %v65_v2 = vld [vmem:[#allocation3] sm:$0xff]  ;;  %v66_v3 = vld [vmem:[#allocation3 + $0x8] sm:$0xff]  ;;  %v90_v10 = vlaneseq  ;;  %s1283_s1 = smov 64  }
  0x29   :  { %174 = vmatprep.mubr.f32.mxu0 %v1282_v1  ;;  %278 = vmatprep.mubr.f32.mxu1 %v1282_v1  ;;  %v966_v4 = vmul.f32 -1.442695, %v65_v2  ;;  %v967_v5 = vmul.f32 -1.442695, %v66_v3  ;;  %v48_v18 = vld [vmem:[#allocation5 + $0x8] sm:$0xff]  ;;  %v50_v19 = vld [vmem:[#allocation5 + $0x18] sm:$0xff] }
  0x2a   :  { %v91_v13 = vand.u32 127, %v90_v10  ;;  %v47_v20 = vld [vmem:[#allocation5] sm:$0xff]  ;;  %v1343_v21 = vpack.c.bf16 %v50_v19, %v48_v18  ;;  %v49_v22 = vld [vmem:[#allocation5 + $0x10] sm:$0xff]  ;;  %v52_v23 = vld [vmem:[#allocation5 + $0x28] sm:$0xff]  ;;  %vm107_vm1 = vcmask 523264   ;;  %s1284_s17 = smov 96  }
  0x2b   :  { %1140 = vpow2.f32 %v966_v4  ;;  %v54_v24 = vld [vmem:[#allocation5 + $0x38] sm:$0xff]  ;;  %v1345_v25 = vpack.c.bf16 %v49_v22, %v47_v20  ;;  %v51_v27 = vld [vmem:[#allocation5 + $0x20] sm:$0xff]  ;;  %v53_v28 = vld [vmem:[#allocation5 + $0x30] sm:$0xff]  ;;  %vm947_vm2 = vcmask 261120   ;;  %vm958_vm3 = vcmask 7168  }
  0x2c   :  { %1142 = vpow2.f32 %v967_v5  ;;  %vm92_vm0 = vcmp.lt.s32.totalorder %v91_v13, 32  ;;  %v1347_v26 = vpack.c.bf16 %v54_v24, %v52_v23  ;;  %v56_v29 = vld [vmem:[#allocation5 + $0x48] sm:$0xff]  ;;  %1005 = vmatprep.subr.bf16.mxu0 %v1343_v21  ;;  %v58_v30 = vld [vmem:[#allocation5 + $0x58] sm:$0xff]  ;;  %1021 = vmatprep.subr.bf16.mxu1 %v1343_v21  ;;  %v1352_v31 = vpack.c.bf16 %v53_v28, %v51_v27  ;;  %v55_v33 = vld [vmem:[#allocation5 + $0x40] sm:$0xff] }
  0x2d   :  { %v969_v17 = vsel %vm92_vm0, 1.0, %v1282_v1  ;;  %1007 = vmatpush1.bf16.msra.mxu0 %v1345_v25  ;;  %1023 = vmatpush1.bf16.msra.mxu1 %v1345_v25  ;;  %v1356_v32 = vpack.c.bf16 %v58_v30, %v56_v29  ;;  %v57_v34 = vld [vmem:[#allocation5 + $0x50] sm:$0xff]  ;;  %v60_v35 = vld [vmem:[#allocation5 + $0x68] sm:$0xff]  ;;  %v62_v36 = vld [vmem:[#allocation5 + $0x78] sm:$0xff] }
  0x2e   :  { %1009 = vmatprep.subr.bf16.mxu0 %v1347_v26  ;;  %1025 = vmatprep.subr.bf16.mxu1 %v1347_v26  ;;  %v1360_v37 = vpack.c.bf16 %v57_v34, %v55_v33  ;;  %v1364_v38 = vpack.c.bf16 %v62_v36, %v60_v35  ;;  %v59_v39 = vld [vmem:[#allocation5 + $0x60] sm:$0xff]  ;;  %v61_v40 = vld [vmem:[#allocation5 + $0x70] sm:$0xff]  ;;  %v103_v51 = vld [vmem:[#allocation3 + $0x18] sm:$0xff] }
  0x2f   :  { %v1368_v41 = vpack.c.bf16 %v61_v40, %v59_v39  ;;  %v102_v50 = vld [vmem:[#allocation3 + $0x10] sm:$0xff] }
  0x31   :  { %1011 = vmatpush1.bf16.msra.mxu0 %v1352_v31  ;;  %1027 = vmatpush1.bf16.msra.mxu1 %v1352_v31 }
  0x32   :  { %1013 = vmatprep.subr.bf16.mxu0 %v1356_v32  ;;  %1029 = vmatprep.subr.bf16.mxu1 %v1356_v32 }
  0x35   :  { %v1141_v6 = vpop.eup %1140  ;;  %1015 = vmatpush1.bf16.msra.mxu0 %v1360_v37  ;;  %1031 = vmatpush1.bf16.msra.mxu1 %v1360_v37 }
  0x36   :  { %v1143_v7 = vpop.eup %1142  ;;  %v73_v8 = vadd.f32 1.0, %v1141_v6  ;;  %1017 = vmatprep.subr.bf16.mxu0 %v1364_v38  ;;  %1033 = vmatprep.subr.bf16.mxu1 %v1364_v38 }
  0x37   :  { %v74_v9 = vadd.f32 1.0, %v1143_v7 }
  0x39   :  { %1144 = vrcp.f32 %v74_v9  ;;  %1019 = vmatpush1.bf16.msra.mxu0 %v1368_v41  ;;  %1035 = vmatpush1.bf16.msra.mxu1 %v1368_v41 }
  0x3a   :  { %1146 = vrcp.f32 %v73_v8  ;;  %1037 = vmatprep.subr.bf16.mxu0 %v1343_v21  ;;  %1053 = vmatprep.subr.bf16.mxu1 %v1343_v21 }
  0x43   :  { %v1145_v11 = vpop.eup %1144 }
  0x44   :  { %v79_v12 = vmul.f32 2.0, %v1145_v11  ;;  %v1147_v14 = vpop.eup %1146 }
  0x45   :  { %v81_v42 = vmul.f32 0.0, %v1147_v14 }
  0x46   :  { %v968_v15 = vadd.f32 -1.0, %v79_v12  ;;  %v208_v12 = vld [vmem:[#allocation3 + $0x28] sm:$0xff] }
  0x48   :  { %v82_v16 = vmul.f32 %v1147_v14, %v968_v15 }
  0x4a   :  { %84 = vrot.lane.b32.xlu0 %v82_v16, %s1283_s1 }
  0x4e   :  { %96 = vrot.lane.b32.xlu0 %v969_v17, %s1283_s1 }
  0xbc   :  { %v85_v43 = vpop.permute.xlu0 %84 }
  0xbd   :  { %v87_v44 = vadd.f32 %v85_v43, %v81_v42  ;;  %v311_v42 = vld [vmem:[#allocation3 + $0x30] sm:$0xff]  ;;  %v312_v43 = vld [vmem:[#allocation3 + $0x38] sm:$0xff] }
  0xbf   :  { %1148 = vtanh.f32 %v87_v44 }
  0xc0   :  { %v97_v47 = vpop.permute.xlu0 %96 }
  0xc1   :  { %v100_v62 = vmul.f32 %v97_v47, %v87_v44 }
  0xc9   :  { %v1149_v45 = vpop.eup %1148 }
  0xca   :  { %v89_v46 = vmul.f32 %v1149_v45, %v1145_v11  ;;  %v207_v11 = vld [vmem:[#allocation3 + $0x20] sm:$0xff] }
  0xcc   :  { %v99_v48 = vmul.f32 %v97_v47, %v89_v46 }
  0xce   :  { %105 = vrot.lane.b32.xlu1 %v99_v48, %s1283_s1 }
 0x140   :  { %v106_v49 = vpop.permute.xlu1 %105 }
 0x141   :  { %970 = vmatmul.mubr.msk.f32.vlgmr.msra.gmra.mrb[0].mxu0 %vm107_vm1, %v106_v49 }
 0x142   :  { %1039 = vmatpush1.bf16.msra.mxu0 %v1345_v25  ;;  %382 = vmatprep.mubr.f32.mxu0 %v1282_v1 }
 0x143   :  { %1041 = vmatprep.subr.bf16.mxu0 %v1347_v26 }
 0x146   :  { %1043 = vmatpush1.bf16.msra.mxu0 %v1352_v31 }
 0x147   :  { %1045 = vmatprep.subr.bf16.mxu0 %v1356_v32 }
 0x14a   :  { %1047 = vmatpush1.bf16.msra.mxu0 %v1360_v37 }
 0x14b   :  { %1049 = vmatprep.subr.bf16.mxu0 %v1364_v38 }
 0x14e   :  { %1051 = vmatpush1.bf16.msra.mxu0 %v1368_v41 }
 0x14f   :  { %1069 = vmatprep.subr.bf16.mxu0 %v1343_v21 }
 0x214   :  { %v176_v52 = vpop.f32.mrb[0].mxu0 }
 0x215   :  { %v181_v53 = vadd.f32 %v176_v52, %v102_v50  ;;  %v178_v54 = vpop.f32.mrb[1].mxu0 }
 0x216   :  { %v182_v55 = vadd.f32 %v178_v54, %v103_v51 }
 0x217   :  { %v971_v56 = vmul.f32 -1.442695, %v181_v53 }
 0x218   :  { %v972_v57 = vmul.f32 -1.442695, %v182_v55 }
 0x219   :  { %1150 = vpow2.f32 %v971_v56 }
 0x21a   :  { %1152 = vpow2.f32 %v972_v57 }
 0x223   :  { %v1151_v58 = vpop.eup %1150 }
 0x224   :  { %v1153_v59 = vpop.eup %1152  ;;  %v189_v60 = vadd.f32 1.0, %v1151_v58 }
 0x225   :  { %v190_v61 = vadd.f32 1.0, %v1153_v59 }
 0x226   :  { %1154 = vrcp.f32 %v189_v60 }
 0x227   :  { %1156 = vrcp.f32 %v190_v61 }
 0x230   :  { %v1155_v63 = vpop.eup %1154 }
 0x231   :  { %v1157_v0 = vpop.eup %1156  ;;  %v197_v2 = vmul.f32 %v1155_v63, %v100_v62 }
 0x232   :  { %v195_v3 = vmul.f32 2.0, %v1157_v0 }
 0x234   :  { %v973_v4 = vadd.f32 -1.0, %v195_v3  ;;  %v416_v3 = vld [vmem:[#allocation3 + $0x48] sm:$0xff] }
 0x236   :  { %v198_v5 = vmul.f32 %v1155_v63, %v973_v4 }
 0x238   :  { %200 = vrot.lane.b32.xlu1 %v198_v5, %s1283_s1 }
 0x2aa   :  { %v201_v6 = vpop.permute.xlu1 %200 }
 0x2ab   :  { %v203_v7 = vadd.f32 %v201_v6, %v197_v2  ;;  %v415_v2 = vld [vmem:[#allocation3 + $0x40] sm:$0xff] }
 0x2ad   :  { %1158 = vtanh.f32 %v203_v7 }
 0x2b7   :  { %v1159_v8 = vpop.eup %1158 }
 0x2b8   :  { %v205_v9 = vmul.f32 %v1159_v8, %v1157_v0 }
 0x2ba   :  { %210 = vrot.lane.b32.xlu0 %v205_v9, %s1283_s1 }
 0x32c   :  { %v211_v10 = vpop.permute.xlu0 %210 }
 0x32d   :  { %974 = vmatmul.mubr.msk.f32.vlgmr.msra.gmra.mrb[0].mxu1 %vm107_vm1, %v211_v10 }
 0x32e   :  { %1055 = vmatpush1.bf16.msra.mxu1 %v1345_v25  ;;  %486 = vmatprep.mubr.f32.mxu1 %v1282_v1 }
 0x32f   :  { %1057 = vmatprep.subr.bf16.mxu1 %v1347_v26 }
 0x332   :  { %1059 = vmatpush1.bf16.msra.mxu1 %v1352_v31 }
 0x333   :  { %1061 = vmatprep.subr.bf16.mxu1 %v1356_v32 }
 0x336   :  { %1063 = vmatpush1.bf16.msra.mxu1 %v1360_v37 }
 0x337   :  { %1065 = vmatprep.subr.bf16.mxu1 %v1364_v38 }
 0x33a   :  { %1067 = vmatpush1.bf16.msra.mxu1 %v1368_v41 }
 0x33b   :  { %1085 = vmatprep.subr.bf16.mxu1 %v1343_v21 }
 0x400   :  { %v280_v13 = vpop.f32.mrb[0].mxu1 }
 0x401   :  { %v285_v14 = vadd.f32 %v280_v13, %v207_v11  ;;  %v282_v15 = vpop.f32.mrb[1].mxu1 }
 0x402   :  { %v286_v16 = vadd.f32 %v282_v15, %v208_v12 }
 0x403   :  { %v975_v17 = vmul.f32 -1.442695, %v285_v14 }
 0x404   :  { %v976_v18 = vmul.f32 -1.442695, %v286_v16 }
 0x405   :  { %1160 = vpow2.f32 %v975_v17 }
 0x406   :  { %1162 = vpow2.f32 %v976_v18 }
 0x40f   :  { %v1161_v19 = vpop.eup %1160 }
 0x410   :  { %v1163_v20 = vpop.eup %1162  ;;  %v293_v23 = vadd.f32 1.0, %v1161_v19 }
 0x411   :  { %v294_v22 = vadd.f32 1.0, %v1163_v20 }
 0x413   :  { %1164 = vrcp.f32 %v294_v22 }
 0x414   :  { %1166 = vrcp.f32 %v293_v23 }
 0x41d   :  { %v1165_v24 = vpop.eup %1164 }
 0x41e   :  { %v299_v27 = vmul.f32 2.0, %v1165_v24  ;;  %v1167_v29 = vpop.eup %1166 }
 0x41f   :  { %v301_v33 = vmul.f32 %v1167_v29, %v203_v7 }
 0x420   :  { %v977_v28 = vadd.f32 -1.0, %v299_v27  ;;  %v519_v27 = vld [vmem:[#allocation3 + $0x50] sm:$0xff] }
 0x422   :  { %v302_v30 = vmul.f32 %v1167_v29, %v977_v28  ;;  %v520_v28 = vld [vmem:[#allocation3 + $0x58] sm:$0xff] }
 0x424   :  { %304 = vrot.lane.b32.xlu1 %v302_v30, %s1283_s1 }
 0x496   :  { %v305_v34 = vpop.permute.xlu1 %304 }
 0x497   :  { %v307_v35 = vadd.f32 %v305_v34, %v301_v33 }
 0x499   :  { %1168 = vtanh.f32 %v307_v35 }
 0x4a3   :  { %v1169_v36 = vpop.eup %1168 }
 0x4a4   :  { %v309_v39 = vmul.f32 %v1169_v36, %v1165_v24 }
 0x4a6   :  { %314 = vrot.lane.b32.xlu0 %v309_v39, %s1283_s1 }
 0x518   :  { %v315_v40 = vpop.permute.xlu0 %314 }
 0x519   :  { %978 = vmatmul.mubr.msk.f32.vlgmr.msra.gmra.mrb[2].mxu0 %vm107_vm1, %v315_v40 }
 0x51a   :  { %1071 = vmatpush1.bf16.msra.mxu0 %v1345_v25  ;;  %590 = vmatprep.mubr.f32.mxu0 %v1282_v1 }
 0x51b   :  { %1073 = vmatprep.subr.bf16.mxu0 %v1347_v26 }
 0x51e   :  { %1075 = vmatpush1.bf16.msra.mxu0 %v1352_v31 }
 0x51f   :  { %1077 = vmatprep.subr.bf16.mxu0 %v1356_v32 }
 0x522   :  { %1079 = vmatpush1.bf16.msra.mxu0 %v1360_v37 }
 0x523   :  { %1081 = vmatprep.subr.bf16.mxu0 %v1364_v38 }
 0x526   :  { %1083 = vmatpush1.bf16.msra.mxu0 %v1368_v41 }
 0x527   :  { %1101 = vmatprep.subr.bf16.mxu0 %v1343_v21 }
 0x5ec   :  { %v384_v44 = vpop.f32.mrb[2].mxu0 }
 0x5ed   :  { %v389_v45 = vadd.f32 %v384_v44, %v311_v42  ;;  %v386_v46 = vpop.f32.mrb[3].mxu0 }
 0x5ee   :  { %v390_v47 = vadd.f32 %v386_v46, %v312_v43 }
 0x5ef   :  { %v979_v48 = vmul.f32 -1.442695, %v389_v45 }
 0x5f0   :  { %v980_v49 = vmul.f32 -1.442695, %v390_v47 }
 0x5f1   :  { %1170 = vpow2.f32 %v979_v48 }
 0x5f2   :  { %1172 = vpow2.f32 %v980_v49 }
 0x5fb   :  { %v1171_v50 = vpop.eup %1170 }
 0x5fc   :  { %v1173_v51 = vpop.eup %1172  ;;  %v397_v53 = vadd.f32 1.0, %v1171_v50 }
 0x5fd   :  { %v398_v52 = vadd.f32 1.0, %v1173_v51 }
 0x5ff   :  { %1174 = vrcp.f32 %v398_v52 }
 0x600   :  { %1176 = vrcp.f32 %v397_v53 }
 0x609   :  { %v1175_v54 = vpop.eup %1174 }
 0x60a   :  { %v403_v55 = vmul.f32 2.0, %v1175_v54  ;;  %v1177_v57 = vpop.eup %1176 }
 0x60b   :  { %v405_v59 = vmul.f32 %v1177_v57, %v307_v35 }
 0x60c   :  { %v981_v56 = vadd.f32 -1.0, %v403_v55  ;;  %v623_v55 = vld [vmem:[#allocation3 + $0x60] sm:$0xff] }
 0x60e   :  { %v406_v58 = vmul.f32 %v1177_v57, %v981_v56  ;;  %v624_v56 = vld [vmem:[#allocation3 + $0x68] sm:$0xff] }
 0x610   :  { %408 = vrot.lane.b32.xlu1 %v406_v58, %s1283_s1 }
 0x682   :  { %v409_v60 = vpop.permute.xlu1 %408 }
 0x683   :  { %v411_v61 = vadd.f32 %v409_v60, %v405_v59 }
 0x685   :  { %1178 = vtanh.f32 %v411_v61 }
 0x68f   :  { %v1179_v62 = vpop.eup %1178 }
 0x690   :  { %v413_v63 = vmul.f32 %v1179_v62, %v1175_v54 }
 0x692   :  { %418 = vrot.lane.b32.xlu0 %v413_v63, %s1283_s1 }
 0x704   :  { %v419_v0 = vpop.permute.xlu0 %418 }
 0x705   :  { %982 = vmatmul.mubr.msk.f32.vlgmr.msra.gmra.mrb[2].mxu1 %vm107_vm1, %v419_v0 }
 0x706   :  { %1087 = vmatpush1.bf16.msra.mxu1 %v1345_v25  ;;  %694 = vmatprep.mubr.f32.mxu1 %v1282_v1 }
 0x707   :  { %1089 = vmatprep.subr.bf16.mxu1 %v1347_v26 }
 0x70a   :  { %1091 = vmatpush1.bf16.msra.mxu1 %v1352_v31 }
 0x70b   :  { %1093 = vmatprep.subr.bf16.mxu1 %v1356_v32 }
 0x70e   :  { %1095 = vmatpush1.bf16.msra.mxu1 %v1360_v37 }
 0x70f   :  { %1097 = vmatprep.subr.bf16.mxu1 %v1364_v38 }
 0x712   :  { %1099 = vmatpush1.bf16.msra.mxu1 %v1368_v41 }
 0x713   :  { %1117 = vmatprep.subr.bf16.mxu1 %v1343_v21 }
 0x7d8   :  { %v488_v4 = vpop.f32.mrb[2].mxu1 }
 0x7d9   :  { %v493_v5 = vadd.f32 %v488_v4, %v415_v2  ;;  %v490_v6 = vpop.f32.mrb[3].mxu1 }
 0x7da   :  { %v494_v7 = vadd.f32 %v490_v6, %v416_v3 }
 0x7db   :  { %v983_v8 = vmul.f32 -1.442695, %v493_v5 }
 0x7dc   :  { %v984_v9 = vmul.f32 -1.442695, %v494_v7  ;;  %v727_v7 = vld [vmem:[#allocation3 + $0x70] sm:$0xff] }
 0x7dd   :  { %1180 = vpow2.f32 %v983_v8  ;;  %v728_v8 = vld [vmem:[#allocation3 + $0x78] sm:$0xff] }
 0x7de   :  { %1182 = vpow2.f32 %v984_v9 }
 0x7e7   :  { %v1181_v10 = vpop.eup %1180 }
 0x7e8   :  { %v1183_v11 = vpop.eup %1182  ;;  %v501_v13 = vadd.f32 1.0, %v1181_v10 }
 0x7e9   :  { %v502_v12 = vadd.f32 1.0, %v1183_v11 }
 0x7eb   :  { %1184 = vrcp.f32 %v502_v12 }
 0x7ec   :  { %1186 = vrcp.f32 %v501_v13 }
 0x7f5   :  { %v1185_v14 = vpop.eup %1184 }
 0x7f6   :  { %v507_v15 = vmul.f32 2.0, %v1185_v14  ;;  %v1187_v21 = vpop.eup %1186 }
 0x7f7   :  { %v509_v18 = vmul.f32 %v1187_v21, %v411_v61 }
 0x7f8   :  { %v985_v16 = vadd.f32 -1.0, %v507_v15 }
 0x7fa   :  { %v510_v17 = vmul.f32 %v1187_v21, %v985_v16 }
 0x7fc   :  { %512 = vrot.lane.b32.xlu1 %v510_v17, %s1283_s1 }
 0x86e   :  { %v513_v19 = vpop.permute.xlu1 %512 }
 0x86f   :  { %v515_v20 = vadd.f32 %v513_v19, %v509_v18 }
 0x871   :  { %1188 = vtanh.f32 %v515_v20 }
 0x87b   :  { %v1189_v22 = vpop.eup %1188 }
 0x87c   :  { %v517_v23 = vmul.f32 %v1189_v22, %v1185_v14 }
 0x87e   :  { %522 = vrot.lane.b32.xlu0 %v517_v23, %s1283_s1 }
 0x8f0   :  { %v523_v24 = vpop.permute.xlu0 %522 }
 0x8f1   :  { %986 = vmatmul.mubr.msk.f32.vlgmr.msra.gmra.mrb[4].mxu0 %vm107_vm1, %v523_v24 }
 0x8f2   :  { %1103 = vmatpush1.bf16.msra.mxu0 %v1345_v25  ;;  %798 = vmatprep.mubr.f32.mxu0 %v1282_v1 }
 0x8f3   :  { %1105 = vmatprep.subr.bf16.mxu0 %v1347_v26 }
 0x8f6   :  { %1107 = vmatpush1.bf16.msra.mxu0 %v1352_v31 }
 0x8f7   :  { %1109 = vmatprep.subr.bf16.mxu0 %v1356_v32 }
 0x8fa   :  { %1111 = vmatpush1.bf16.msra.mxu0 %v1360_v37 }
 0x8fb   :  { %1113 = vmatprep.subr.bf16.mxu0 %v1364_v38 }
 0x8fe   :  { %1115 = vmatpush1.bf16.msra.mxu0 %v1368_v41 }
 0x9c4   :  { %v592_v29 = vpop.f32.mrb[4].mxu0 }
 0x9c5   :  { %v597_v30 = vadd.f32 %v592_v29, %v519_v27  ;;  %v594_v33 = vpop.f32.mrb[5].mxu0 }
 0x9c6   :  { %v598_v34 = vadd.f32 %v594_v33, %v520_v28 }
 0x9c7   :  { %v987_v35 = vmul.f32 -1.442695, %v597_v30 }
 0x9c8   :  { %v988_v36 = vmul.f32 -1.442695, %v598_v34  ;;  %v1002_v34 = vld [vmem:[%s1461_s2] ss:$0 sm:$0xff]  ;;  %s1285_s2 = smov 32  }
 0x9c9   :  { %1190 = vpow2.f32 %v987_v35  ;;  %v831_v35 = vld [vmem:[#allocation3 + $0x80] sm:$0xff] }
 0x9ca   :  { %1192 = vpow2.f32 %v988_v36  ;;  %v832_v36 = vld [vmem:[#allocation3 + $0x88] sm:$0xff] }
 0x9d3   :  { %v1191_v39 = vpop.eup %1190 }
 0x9d4   :  { %v1193_v40 = vpop.eup %1192  ;;  %v605_v43 = vadd.f32 1.0, %v1191_v39 }
 0x9d5   :  { %v606_v42 = vadd.f32 1.0, %v1193_v40 }
 0x9d7   :  { %1194 = vrcp.f32 %v606_v42 }
 0x9d8   :  { %1196 = vrcp.f32 %v605_v43 }
 0x9e1   :  { %v1195_v44 = vpop.eup %1194 }
 0x9e2   :  { %v611_v45 = vmul.f32 2.0, %v1195_v44  ;;  %v1197_v47 = vpop.eup %1196 }
 0x9e3   :  { %v613_v49 = vmul.f32 %v1197_v47, %v515_v20 }
 0x9e4   :  { %v989_v46 = vadd.f32 -1.0, %v611_v45 }
 0x9e6   :  { %v614_v48 = vmul.f32 %v1197_v47, %v989_v46 }
 0x9e8   :  { %616 = vrot.lane.b32.xlu1 %v614_v48, %s1283_s1 }
 0xa5a   :  { %v617_v50 = vpop.permute.xlu1 %616 }
 0xa5b   :  { %v619_v51 = vadd.f32 %v617_v50, %v613_v49 }
 0xa5d   :  { %1198 = vtanh.f32 %v619_v51 }
 0xa67   :  { %v1199_v52 = vpop.eup %1198 }
 0xa68   :  { %v621_v53 = vmul.f32 %v1199_v52, %v1195_v44 }
 0xa6a   :  { %626 = vrot.lane.b32.xlu0 %v621_v53, %s1283_s1 }
 0xadc   :  { %v627_v54 = vpop.permute.xlu0 %626 }
 0xadd   :  { %990 = vmatmul.mubr.msk.f32.vlgmr.msra.gmra.mrb[4].mxu1 %vm107_vm1, %v627_v54 }
 0xade   :  { %1119 = vmatpush1.bf16.msra.mxu1 %v1345_v25  ;;  %902 = vmatprep.mubr.f32.mxu1 %v1282_v1 }
 0xadf   :  { %1121 = vmatprep.subr.bf16.mxu1 %v1347_v26 }
 0xae2   :  { %1123 = vmatpush1.bf16.msra.mxu1 %v1352_v31 }
 0xae3   :  { %1125 = vmatprep.subr.bf16.mxu1 %v1356_v32 }
 0xae6   :  { %1127 = vmatpush1.bf16.msra.mxu1 %v1360_v37 }
 0xae7   :  { %1129 = vmatprep.subr.bf16.mxu1 %v1364_v38 }
 0xaea   :  { %1131 = vmatpush1.bf16.msra.mxu1 %v1368_v41 }
 0xbb0   :  { %v696_v57 = vpop.f32.mrb[4].mxu1 }
 0xbb1   :  { %v701_v58 = vadd.f32 %v696_v57, %v623_v55  ;;  %v698_v59 = vpop.f32.mrb[5].mxu1 }
 0xbb2   :  { %v702_v25 = vadd.f32 %v698_v59, %v624_v56 }
 0xbb3   :  { %v991_v60 = vmul.f32 -1.442695, %v701_v58 }
 0xbb4   :  { %v992_v1 = vmul.f32 -1.442695, %v702_v25 }
 0xbb5   :  { %1200 = vpow2.f32 %v991_v60 }
 0xbb6   :  { %1202 = vpow2.f32 %v992_v1 }
 0xbbf   :  { %v1201_v26 = vpop.eup %1200 }
 0xbc0   :  { %v1203_v31 = vpop.eup %1202  ;;  %v709_v32 = vadd.f32 1.0, %v1201_v26 }
 0xbc1   :  { %v710_v61 = vadd.f32 1.0, %v1203_v31  ;;  %v1003_v31 = vld [vmem:[#allocation2] ss:$0 sm:$0xff] }
 0xbc3   :  { %1204 = vrcp.f32 %v710_v61 }
 0xbc4   :  { %1206 = vrcp.f32 %v709_v32 }
 0xbcd   :  { %v1205_v37 = vpop.eup %1204 }
 0xbce   :  { %v715_v38 = vmul.f32 2.0, %v1205_v37  ;;  %v1207_v41 = vpop.eup %1206 }
 0xbcf   :  { %v717_v0 = vmul.f32 %v1207_v41, %v619_v51 }
 0xbd0   :  { %v993_v62 = vadd.f32 -1.0, %v715_v38 }
 0xbd2   :  { %v718_v63 = vmul.f32 %v1207_v41, %v993_v62 }
 0xbd4   :  { %720 = vrot.lane.b32.xlu1 %v718_v63, %s1283_s1 }
 0xc46   :  { %v721_v2 = vpop.permute.xlu1 %720 }
 0xc47   :  { %v723_v3 = vadd.f32 %v721_v2, %v717_v0 }
 0xc49   :  { %1208 = vtanh.f32 %v723_v3 }
 0xc53   :  { %v1209_v4 = vpop.eup %1208 }
 0xc54   :  { %v725_v5 = vmul.f32 %v1209_v4, %v1205_v37 }
 0xc56   :  { %730 = vrot.lane.b32.xlu0 %v725_v5, %s1283_s1 }
 0xcc8   :  { %v731_v6 = vpop.permute.xlu0 %730 }
 0xcc9   :  { %994 = vmatmul.mubr.msk.f32.vlgmr.msra.gmra.mrb[6].mxu0 %vm107_vm1, %v731_v6 }
 0xd9c   :  { %v800_v9 = vpop.f32.mrb[6].mxu0 }
 0xd9d   :  { %v805_v10 = vadd.f32 %v800_v9, %v727_v7  ;;  %v802_v11 = vpop.f32.mrb[7].mxu0 }
 0xd9e   :  { %v806_v12 = vadd.f32 %v802_v11, %v728_v8 }
 0xd9f   :  { %v995_v13 = vmul.f32 -1.442695, %v805_v10 }
 0xda0   :  { %v996_v14 = vmul.f32 -1.442695, %v806_v12 }
 0xda1   :  { %1210 = vpow2.f32 %v995_v13 }
 0xda2   :  { %1212 = vpow2.f32 %v996_v14 }
 0xdab   :  { %v1211_v15 = vpop.eup %1210 }
 0xdac   :  { %v1213_v16 = vpop.eup %1212  ;;  %v813_v17 = vadd.f32 1.0, %v1211_v15 }
 0xdad   :  { %v814_v21 = vadd.f32 1.0, %v1213_v16 }
 0xdaf   :  { %1214 = vrcp.f32 %v814_v21 }
 0xdb0   :  { %1216 = vrcp.f32 %v813_v17 }
 0xdb9   :  { %v1215_v18 = vpop.eup %1214 }
 0xdba   :  { %v819_v19 = vmul.f32 2.0, %v1215_v18  ;;  %v1217_v22 = vpop.eup %1216 }
 0xdbb   :  { %v821_v24 = vmul.f32 %v1217_v22, %v723_v3 }
 0xdbc   :  { %v997_v20 = vadd.f32 -1.0, %v819_v19 }
 0xdbe   :  { %v822_v23 = vmul.f32 %v1217_v22, %v997_v20 }
 0xdc0   :  { %824 = vrot.lane.b32.xlu1 %v822_v23, %s1283_s1 }
 0xe32   :  { %v825_v27 = vpop.permute.xlu1 %824 }
 0xe33   :  { %v827_v28 = vadd.f32 %v825_v27, %v821_v24 }
 0xe35   :  { %1218 = vtanh.f32 %v827_v28 }
 0xe3f   :  { %v1219_v29 = vpop.eup %1218 }
 0xe40   :  { %v829_v30 = vmul.f32 %v1219_v29, %v1215_v18 }
 0xe42   :  { %834 = vrot.lane.b32.xlu0 %v829_v30, %s1283_s1 }
 0xe46   :  { %939 = vrot.lane.b32.xlu0 %v1002_v34, %s1284_s17 }
 0xeb4   :  { %v835_v33 = vpop.permute.xlu0 %834 }
 0xeb5   :  { %998 = vmatmul.mubr.msk.f32.vlgmr.msra.gmra.mrb[6].mxu1 %vm107_vm1, %v835_v33 }
 0xeb8   :  { %v940_v59 = vpop.permute.xlu0 %939 }
 0xf88   :  { %v904_v39 = vpop.f32.mrb[6].mxu1 }
 0xf89   :  { %v909_v40 = vadd.f32 %v904_v39, %v831_v35  ;;  %v906_v42 = vpop.f32.mrb[7].mxu1 }
 0xf8a   :  { %v910_v43 = vadd.f32 %v906_v42, %v832_v36 }
 0xf8b   :  { %v999_v44 = vmul.f32 -1.442695, %v909_v40 }
 0xf8c   :  { %v1000_v45 = vmul.f32 -1.442695, %v910_v43 }
 0xf8d   :  { %1220 = vpow2.f32 %v999_v44 }
 0xf8e   :  { %1222 = vpow2.f32 %v1000_v45 }
 0xf97   :  { %v1221_v46 = vpop.eup %1220 }
 0xf98   :  { %v1223_v47 = vpop.eup %1222  ;;  %v917_v49 = vadd.f32 1.0, %v1221_v46 }
 0xf99   :  { %v918_v48 = vadd.f32 1.0, %v1223_v47 }
 0xf9b   :  { %1224 = vrcp.f32 %v918_v48 }
 0xf9c   :  { %1226 = vrcp.f32 %v917_v49 }
 0xfa5   :  { %v1225_v50 = vpop.eup %1224 }
 0xfa6   :  { %v923_v51 = vmul.f32 2.0, %v1225_v50  ;;  %v1227_v53 = vpop.eup %1226 }
 0xfa7   :  { %v925_v55 = vmul.f32 %v1227_v53, %v827_v28 }
 0xfa8   :  { %v1001_v52 = vadd.f32 -1.0, %v923_v51 }
 0xfaa   :  { %v926_v54 = vmul.f32 %v1227_v53, %v1001_v52 }
 0xfac   :  { %928 = vrot.lane.b32.xlu1 %v926_v54, %s1283_s1 }
0x101e   :  { %v929_v56 = vpop.permute.xlu1 %928 }
0x101f   :  { %v931_v57 = vadd.f32 %v929_v56, %v925_v55 }
0x1021   :  { %1228 = vtanh.f32 %v931_v57 }
0x102b   :  { %v1229_v58 = vpop.eup %1228 }
0x102c   :  { %v933_v25 = vmul.f32 %v1229_v58, %v1225_v50 }
0x102e   :  { %v942_v60 = vmul.f32 %v940_v59, %v933_v25 }
0x1030   :  { %944 = vrot.lane.b32.xlu1 %v942_v60, %s1285_s2 }
0x10a2   :  { %v945_v1 = vpop.permute.xlu1 %944 }
0x10a3   :  { %v948_v26 = vsel %vm947_vm2, %v945_v1, 0.0 }
0x10a4   :  { %949 = vadd.xlane.f32.xlu0 %v948_v26 }
0x1131   :  { %v950_v61 = vpop.xlane.xlu0 %949 }
0x1132   :  { %v957_v32 = vadd.f32 %v1003_v31, %v950_v61 }
0x1134   :  { %959 = vst.msk [vmem:[%s1463_s4] sm:$0xff] %vm958_vm3, %v957_v32 }
0x1135   :  { %964 = vsyncpa [#allocation4], 1 }
0x1136   :  { %965 = vsyncpa [#allocation6], 1 }

</bundles_post_ra>
